<compile_context>
chip_gen: v6e
topology: v6e:2x2x1
jax: 0.10.0
libtpu: 0.0.40
codegen_flags: <defaults>
</compile_context>

<pallas_src>
import math

import jax
import jax.numpy as jnp
from jax.experimental import pallas as pl
from jax.experimental.pallas import tpu as pltpu

HIDDEN_DIM = 8
HEAD_NUM = 4
HEAD_DIM = HIDDEN_DIM // HEAD_NUM   # 2
MAX_TILE = 2048                     # tokens per grid step (lane axis), multiple of 128


def mha_kernel(xT_ref, wq_ref, bq_ref, wo_ref, bo_ref, o_ref):
    # xT: (HIDDEN, TILE) -- hidden on sublanes, tokens on lanes.
    xT = xT_ref[...].astype(jnp.float32)

    # Q = K = V = x @ Wq^T + bq  (the module calls self.q three times),
    # computed transposed as ONE lane-dense (8,8)@(8,TILE) MXU matmul.
    qT = jnp.dot(wq_ref[...], xT,
                 preferred_element_type=jnp.float32,
                 precision=jax.lax.Precision.HIGHEST) + bq_ref[...]

    scale = 1.0 / math.sqrt(HEAD_DIM)
    # Row d of qT is feature d for every token; head i owns rows [2i, 2i+1].
    rows = [qT[d:d + 1, :] for d in range(HIDDEN_DIM)]           # each (1, TILE)
    krows = [r * scale for r in rows]                            # pre-scaled "key" side

    out_rows = []
    for i in range(HEAD_NUM):
        qi0, qi1 = rows[2 * i], rows[2 * i + 1]
        # scores of query-head i vs every key-head, per token:
        # pure full-lane VPU FMAs, no cross-lane reductions, no tiny lane slices.
        s = [qi0 * krows[2 * j] + qi1 * krows[2 * j + 1] for j in range(HEAD_NUM)]
        m = s[0]
        for j in range(1, HEAD_NUM):
            m = jnp.maximum(m, s[j])
        e = [jnp.exp(sj - m) for sj in s]                        # EUP, full lanes
        denom = e[0]
        for j in range(1, HEAD_NUM):
            denom = denom + e[j]
        inv = pl.reciprocal(denom)                               # exact (matches reference)
        w = [ej * inv for ej in e]
        # TODO(synk): train-mode nn.Dropout on attention weights not implemented
        # (kernel reproduces eval/inference semantics where dropout is identity).
        o0 = w[0] * rows[0]
        o1 = w[0] * rows[1]
        for j in range(1, HEAD_NUM):
            o0 = o0 + w[j] * rows[2 * j]
            o1 = o1 + w[j] * rows[2 * j + 1]
        out_rows.append(o0)
        out_rows.append(o1)

    oT = jnp.concatenate(out_rows, axis=0)                       # (8, TILE)
    # Output projection folded into a single lane-dense (8,8)@(8,TILE) matmul.
    outT = jnp.dot(wo_ref[...], oT,
                   preferred_element_type=jnp.float32,
                   precision=jax.lax.Precision.HIGHEST) + bo_ref[...]
    o_ref[...] = outT.astype(o_ref.dtype)


def mha_forward(x, wq, bq, wo, bo):
    """wq / wo are PyTorch-layout (out, in) Linear weights; bq / bo are (H,)."""
    b, s, h = x.shape
    assert h == HIDDEN_DIM
    n = b * s

    lane = 128
    n_lane = pl.cdiv(n, lane) * lane
    # >=2 grid steps so a v7x megacore has parallel work to split; tiles as large
    # as possible (up to MAX_TILE) so single-TC v5e/v6e pay minimal per-step overhead.
    num_tiles = max(2, pl.cdiv(n_lane, MAX_TILE))
    tile = pl.cdiv(n_lane, num_tiles * lane) * lane
    n_pad = tile * num_tiles

    # Tokens on the lane axis: (HIDDEN, N_pad), zero-padded tail tokens (sliced off below).
    xT = jnp.zeros((h, n_pad), x.dtype).at[:, :n].set(x.reshape(n, h).T)

    outT = pl.pallas_call(
        mha_kernel,
        out_shape=jax.ShapeDtypeStruct((h, n_pad), x.dtype),
        grid_spec=pltpu.PrefetchScalarGridSpec(
            num_scalar_prefetch=0,
            grid=(num_tiles,),
            in_specs=[
                pl.BlockSpec((h, tile), lambda i: (0, i)),   # x^T token tile
                pl.BlockSpec((h, h), lambda i: (0, 0)),      # Wq (out, in)
                pl.BlockSpec((h, 1), lambda i: (0, 0)),      # bq as a column
                pl.BlockSpec((h, h), lambda i: (0, 0)),      # Wo (out, in)
                pl.BlockSpec((h, 1), lambda i: (0, 0)),      # bo as a column
            ],
            out_specs=pl.BlockSpec((h, tile), lambda i: (0, i)),
        ),
        compiler_params=pltpu.CompilerParams(dimension_semantics=("parallel",)),
    )(xT, wq, bq.reshape(h, 1), wo, bo.reshape(h, 1))

    return outT[:, :n].T.reshape(b, s, h)


def reference(x, wq, bq, wo, bo):
    """Plain-JAX mirror of the PyTorch forward (eval mode). Q == K == V."""
    b, s, h = x.shape
    q = x @ wq.T + bq
    Q = q.reshape(b, s, HEAD_NUM, HEAD_DIM)
    aw = jnp.einsum("bsid,bsjd->bsij", Q, Q) / math.sqrt(HEAD_DIM)
    aw = jax.nn.softmax(aw, axis=-1)
    out = jnp.einsum("bsij,bsjd->bsid", aw, Q).reshape(b, s, h)
    return out @ wo.T + bo


if __name__ == "__main__":
    key = jax.random.PRNGKey(0)
    kx, kwq, kbq, kwo, kbo = jax.random.split(key, 5)

    B, S = 2, 8
    x = jax.random.normal(kx, (B, S, HIDDEN_DIM), dtype=jnp.float32)

    # nn.Linear-style init (uniform +/- 1/sqrt(fan_in)); weights kept in the
    # PyTorch (out, in) layout because the kernel computes q^T = W @ x^T.
    bound = 1.0 / math.sqrt(HIDDEN_DIM)
    wq = jax.random.uniform(kwq, (HIDDEN_DIM, HIDDEN_DIM), jnp.float32, -bound, bound)
    bq = jax.random.uniform(kbq, (HIDDEN_DIM,), jnp.float32, -bound, bound)
    wo = jax.random.uniform(kwo, (HIDDEN_DIM, HIDDEN_DIM), jnp.float32, -bound, bound)
    bo = jax.random.uniform(kbo, (HIDDEN_DIM,), jnp.float32, -bound, bound)
    # The module also owns k/v Linear layers, but the forward never uses them
    # (it calls self.q for Q, K and V), so they are not materialized here.

    out = jax.block_until_ready(mha_forward(x, wq, bq, wo, bo))
    ref = reference(x, wq, bq, wo, bo)
    err = float(jnp.max(jnp.abs(out - ref)))
    assert err < 1e-3, err
    print("KERNEL_OK")
</pallas_src>

<mosaic_0001>
module attributes {stable_mosaic.version = 11 : i64} {
  func.func @mha_kernel(%arg0: i32, %arg1: memref<8x128xf32, #tpu.memory_space<vmem>>, %arg2: memref<8x8xf32, #tpu.memory_space<vmem>>, %arg3: memref<8x1xf32, #tpu.memory_space<vmem>>, %arg4: memref<8x8xf32, #tpu.memory_space<vmem>>, %arg5: memref<8x1xf32, #tpu.memory_space<vmem>>, %arg6: memref<8x128xf32, #tpu.memory_space<vmem>>) attributes {dimension_semantics = [#tpu.dimension_semantics<parallel>], iteration_bounds = array<i64: 2>, scalar_prefetch = 0 : i64, scratch_operands = 0 : i64, tpu.core_type = #tpu.core_type<tc>, window_params = [{transform_indices = @transform_0, window_bounds = array<i64: 8, 128>}, {pipeline_mode = #tpu.pipeline_mode<synchronous>, transform_indices = @transform_1, window_bounds = array<i64: 8, 8>}, {pipeline_mode = #tpu.pipeline_mode<synchronous>, transform_indices = @transform_2, window_bounds = array<i64: 8, 1>}, {pipeline_mode = #tpu.pipeline_mode<synchronous>, transform_indices = @transform_3, window_bounds = array<i64: 8, 8>}, {pipeline_mode = #tpu.pipeline_mode<synchronous>, transform_indices = @transform_4, window_bounds = array<i64: 8, 1>}, {transform_indices = @transform_5, window_bounds = array<i64: 8, 128>}]} {
    %c0 = arith.constant 0 : index
    %c0_0 = arith.constant 0 : index
    %0 = vector.load %arg1[%c0, %c0_0] : memref<8x128xf32, #tpu.memory_space<vmem>>, vector<8x128xf32>
    %c0_1 = arith.constant 0 : index
    %c0_2 = arith.constant 0 : index
    %1 = vector.load %arg2[%c0_1, %c0_2] : memref<8x8xf32, #tpu.memory_space<vmem>>, vector<8x8xf32>
    %cst = arith.constant dense<0.000000e+00> : vector<8x128xf32>
    %2 = tpu.matmul %1, %0, %cst {dimension_numbers = #tpu.dot_dimension_numbers<[1], [0], [0], [1], [0, 0, 1, 1], [], []>, precision = #tpu.contract_precision<fp32>} : vector<8x8xf32>, vector<8x128xf32>, vector<8x128xf32> -> vector<8x128xf32>
    %c0_3 = arith.constant 0 : index
    %c0_4 = arith.constant 0 : index
    %3 = vector.load %arg3[%c0_3, %c0_4] : memref<8x1xf32, #tpu.memory_space<vmem>>, vector<8x1xf32>
    %4 = vector.broadcast %3 : vector<8x1xf32> to vector<8x128xf32>
    %5 = arith.addf %2, %4 : vector<8x128xf32>
    %6 = vector.extract_strided_slice %5 {offsets = [0, 0], sizes = [1, 128], strides = [1, 1]} : vector<8x128xf32> to vector<1x128xf32>
    %7 = vector.extract_strided_slice %5 {offsets = [1, 0], sizes = [1, 128], strides = [1, 1]} : vector<8x128xf32> to vector<1x128xf32>
    %8 = vector.extract_strided_slice %5 {offsets = [2, 0], sizes = [1, 128], strides = [1, 1]} : vector<8x128xf32> to vector<1x128xf32>
    %9 = vector.extract_strided_slice %5 {offsets = [3, 0], sizes = [1, 128], strides = [1, 1]} : vector<8x128xf32> to vector<1x128xf32>
    %10 = vector.extract_strided_slice %5 {offsets = [4, 0], sizes = [1, 128], strides = [1, 1]} : vector<8x128xf32> to vector<1x128xf32>
    %11 = vector.extract_strided_slice %5 {offsets = [5, 0], sizes = [1, 128], strides = [1, 1]} : vector<8x128xf32> to vector<1x128xf32>
    %12 = vector.extract_strided_slice %5 {offsets = [6, 0], sizes = [1, 128], strides = [1, 1]} : vector<8x128xf32> to vector<1x128xf32>
    %13 = vector.extract_strided_slice %5 {offsets = [7, 0], sizes = [1, 128], strides = [1, 1]} : vector<8x128xf32> to vector<1x128xf32>
    %cst_5 = arith.constant 0.707106769 : f32
    %14 = vector.broadcast %cst_5 : f32 to vector<1x128xf32>
    %15 = arith.mulf %6, %14 : vector<1x128xf32>
    %cst_6 = arith.constant 0.707106769 : f32
    %16 = vector.broadcast %cst_6 : f32 to vector<1x128xf32>
    %17 = arith.mulf %7, %16 : vector<1x128xf32>
    %cst_7 = arith.constant 0.707106769 : f32
    %18 = vector.broadcast %cst_7 : f32 to vector<1x128xf32>
    %19 = arith.mulf %8, %18 : vector<1x128xf32>
    %cst_8 = arith.constant 0.707106769 : f32
    %20 = vector.broadcast %cst_8 : f32 to vector<1x128xf32>
    %21 = arith.mulf %9, %20 : vector<1x128xf32>
    %cst_9 = arith.constant 0.707106769 : f32
    %22 = vector.broadcast %cst_9 : f32 to vector<1x128xf32>
    %23 = arith.mulf %10, %22 : vector<1x128xf32>
    %cst_10 = arith.constant 0.707106769 : f32
    %24 = vector.broadcast %cst_10 : f32 to vector<1x128xf32>
    %25 = arith.mulf %11, %24 : vector<1x128xf32>
    %cst_11 = arith.constant 0.707106769 : f32
    %26 = vector.broadcast %cst_11 : f32 to vector<1x128xf32>
    %27 = arith.mulf %12, %26 : vector<1x128xf32>
    %cst_12 = arith.constant 0.707106769 : f32
    %28 = vector.broadcast %cst_12 : f32 to vector<1x128xf32>
    %29 = arith.mulf %13, %28 : vector<1x128xf32>
    %30 = arith.mulf %6, %15 : vector<1x128xf32>
    %31 = arith.mulf %7, %17 : vector<1x128xf32>
    %32 = arith.addf %30, %31 : vector<1x128xf32>
    %33 = arith.mulf %6, %19 : vector<1x128xf32>
    %34 = arith.mulf %7, %21 : vector<1x128xf32>
    %35 = arith.addf %33, %34 : vector<1x128xf32>
    %36 = arith.mulf %6, %23 : vector<1x128xf32>
    %37 = arith.mulf %7, %25 : vector<1x128xf32>
    %38 = arith.addf %36, %37 : vector<1x128xf32>
    %39 = arith.mulf %6, %27 : vector<1x128xf32>
    %40 = arith.mulf %7, %29 : vector<1x128xf32>
    %41 = arith.addf %39, %40 : vector<1x128xf32>
    %42 = arith.maximumf %32, %35 : vector<1x128xf32>
    %43 = arith.maximumf %42, %38 : vector<1x128xf32>
    %44 = arith.maximumf %43, %41 : vector<1x128xf32>
    %45 = arith.subf %32, %44 : vector<1x128xf32>
    %46 = math.exp %45 : vector<1x128xf32>
    %47 = arith.subf %35, %44 : vector<1x128xf32>
    %48 = math.exp %47 : vector<1x128xf32>
    %49 = arith.subf %38, %44 : vector<1x128xf32>
    %50 = math.exp %49 : vector<1x128xf32>
    %51 = arith.subf %41, %44 : vector<1x128xf32>
    %52 = math.exp %51 : vector<1x128xf32>
    %53 = arith.addf %46, %48 : vector<1x128xf32>
    %54 = arith.addf %53, %50 : vector<1x128xf32>
    %55 = arith.addf %54, %52 : vector<1x128xf32>
    %56 = tpu.reciprocal %55 : vector<1x128xf32> -> vector<1x128xf32>
    %57 = arith.mulf %46, %56 : vector<1x128xf32>
    %58 = arith.mulf %48, %56 : vector<1x128xf32>
    %59 = arith.mulf %50, %56 : vector<1x128xf32>
    %60 = arith.mulf %52, %56 : vector<1x128xf32>
    %61 = arith.mulf %57, %6 : vector<1x128xf32>
    %62 = arith.mulf %57, %7 : vector<1x128xf32>
    %63 = arith.mulf %58, %8 : vector<1x128xf32>
    %64 = arith.addf %61, %63 : vector<1x128xf32>
    %65 = arith.mulf %58, %9 : vector<1x128xf32>
    %66 = arith.addf %62, %65 : vector<1x128xf32>
    %67 = arith.mulf %59, %10 : vector<1x128xf32>
    %68 = arith.addf %64, %67 : vector<1x128xf32>
    %69 = arith.mulf %59, %11 : vector<1x128xf32>
    %70 = arith.addf %66, %69 : vector<1x128xf32>
    %71 = arith.mulf %60, %12 : vector<1x128xf32>
    %72 = arith.addf %68, %71 : vector<1x128xf32>
    %73 = arith.mulf %60, %13 : vector<1x128xf32>
    %74 = arith.addf %70, %73 : vector<1x128xf32>
    %75 = arith.mulf %8, %15 : vector<1x128xf32>
    %76 = arith.mulf %9, %17 : vector<1x128xf32>
    %77 = arith.addf %75, %76 : vector<1x128xf32>
    %78 = arith.mulf %8, %19 : vector<1x128xf32>
    %79 = arith.mulf %9, %21 : vector<1x128xf32>
    %80 = arith.addf %78, %79 : vector<1x128xf32>
    %81 = arith.mulf %8, %23 : vector<1x128xf32>
    %82 = arith.mulf %9, %25 : vector<1x128xf32>
    %83 = arith.addf %81, %82 : vector<1x128xf32>
    %84 = arith.mulf %8, %27 : vector<1x128xf32>
    %85 = arith.mulf %9, %29 : vector<1x128xf32>
    %86 = arith.addf %84, %85 : vector<1x128xf32>
    %87 = arith.maximumf %77, %80 : vector<1x128xf32>
    %88 = arith.maximumf %87, %83 : vector<1x128xf32>
    %89 = arith.maximumf %88, %86 : vector<1x128xf32>
    %90 = arith.subf %77, %89 : vector<1x128xf32>
    %91 = math.exp %90 : vector<1x128xf32>
    %92 = arith.subf %80, %89 : vector<1x128xf32>
    %93 = math.exp %92 : vector<1x128xf32>
    %94 = arith.subf %83, %89 : vector<1x128xf32>
    %95 = math.exp %94 : vector<1x128xf32>
    %96 = arith.subf %86, %89 : vector<1x128xf32>
    %97 = math.exp %96 : vector<1x128xf32>
    %98 = arith.addf %91, %93 : vector<1x128xf32>
    %99 = arith.addf %98, %95 : vector<1x128xf32>
    %100 = arith.addf %99, %97 : vector<1x128xf32>
    %101 = tpu.reciprocal %100 : vector<1x128xf32> -> vector<1x128xf32>
    %102 = arith.mulf %91, %101 : vector<1x128xf32>
    %103 = arith.mulf %93, %101 : vector<1x128xf32>
    %104 = arith.mulf %95, %101 : vector<1x128xf32>
    %105 = arith.mulf %97, %101 : vector<1x128xf32>
    %106 = arith.mulf %102, %6 : vector<1x128xf32>
    %107 = arith.mulf %102, %7 : vector<1x128xf32>
    %108 = arith.mulf %103, %8 : vector<1x128xf32>
    %109 = arith.addf %106, %108 : vector<1x128xf32>
    %110 = arith.mulf %103, %9 : vector<1x128xf32>
    %111 = arith.addf %107, %110 : vector<1x128xf32>
    %112 = arith.mulf %104, %10 : vector<1x128xf32>
    %113 = arith.addf %109, %112 : vector<1x128xf32>
    %114 = arith.mulf %104, %11 : vector<1x128xf32>
    %115 = arith.addf %111, %114 : vector<1x128xf32>
    %116 = arith.mulf %105, %12 : vector<1x128xf32>
    %117 = arith.addf %113, %116 : vector<1x128xf32>
    %118 = arith.mulf %105, %13 : vector<1x128xf32>
    %119 = arith.addf %115, %118 : vector<1x128xf32>
    %120 = arith.mulf %10, %15 : vector<1x128xf32>
    %121 = arith.mulf %11, %17 : vector<1x128xf32>
    %122 = arith.addf %120, %121 : vector<1x128xf32>
    %123 = arith.mulf %10, %19 : vector<1x128xf32>
    %124 = arith.mulf %11, %21 : vector<1x128xf32>
    %125 = arith.addf %123, %124 : vector<1x128xf32>
    %126 = arith.mulf %10, %23 : vector<1x128xf32>
    %127 = arith.mulf %11, %25 : vector<1x128xf32>
    %128 = arith.addf %126, %127 : vector<1x128xf32>
    %129 = arith.mulf %10, %27 : vector<1x128xf32>
    %130 = arith.mulf %11, %29 : vector<1x128xf32>
    %131 = arith.addf %129, %130 : vector<1x128xf32>
    %132 = arith.maximumf %122, %125 : vector<1x128xf32>
    %133 = arith.maximumf %132, %128 : vector<1x128xf32>
    %134 = arith.maximumf %133, %131 : vector<1x128xf32>
    %135 = arith.subf %122, %134 : vector<1x128xf32>
    %136 = math.exp %135 : vector<1x128xf32>
    %137 = arith.subf %125, %134 : vector<1x128xf32>
    %138 = math.exp %137 : vector<1x128xf32>
    %139 = arith.subf %128, %134 : vector<1x128xf32>
    %140 = math.exp %139 : vector<1x128xf32>
    %141 = arith.subf %131, %134 : vector<1x128xf32>
    %142 = math.exp %141 : vector<1x128xf32>
    %143 = arith.addf %136, %138 : vector<1x128xf32>
    %144 = arith.addf %143, %140 : vector<1x128xf32>
    %145 = arith.addf %144, %142 : vector<1x128xf32>
    %146 = tpu.reciprocal %145 : vector<1x128xf32> -> vector<1x128xf32>
    %147 = arith.mulf %136, %146 : vector<1x128xf32>
    %148 = arith.mulf %138, %146 : vector<1x128xf32>
    %149 = arith.mulf %140, %146 : vector<1x128xf32>
    %150 = arith.mulf %142, %146 : vector<1x128xf32>
    %151 = arith.mulf %147, %6 : vector<1x128xf32>
    %152 = arith.mulf %147, %7 : vector<1x128xf32>
    %153 = arith.mulf %148, %8 : vector<1x128xf32>
    %154 = arith.addf %151, %153 : vector<1x128xf32>
    %155 = arith.mulf %148, %9 : vector<1x128xf32>
    %156 = arith.addf %152, %155 : vector<1x128xf32>
    %157 = arith.mulf %149, %10 : vector<1x128xf32>
    %158 = arith.addf %154, %157 : vector<1x128xf32>
    %159 = arith.mulf %149, %11 : vector<1x128xf32>
    %160 = arith.addf %156, %159 : vector<1x128xf32>
    %161 = arith.mulf %150, %12 : vector<1x128xf32>
    %162 = arith.addf %158, %161 : vector<1x128xf32>
    %163 = arith.mulf %150, %13 : vector<1x128xf32>
    %164 = arith.addf %160, %163 : vector<1x128xf32>
    %165 = arith.mulf %12, %15 : vector<1x128xf32>
    %166 = arith.mulf %13, %17 : vector<1x128xf32>
    %167 = arith.addf %165, %166 : vector<1x128xf32>
    %168 = arith.mulf %12, %19 : vector<1x128xf32>
    %169 = arith.mulf %13, %21 : vector<1x128xf32>
    %170 = arith.addf %168, %169 : vector<1x128xf32>
    %171 = arith.mulf %12, %23 : vector<1x128xf32>
    %172 = arith.mulf %13, %25 : vector<1x128xf32>
    %173 = arith.addf %171, %172 : vector<1x128xf32>
    %174 = arith.mulf %12, %27 : vector<1x128xf32>
    %175 = arith.mulf %13, %29 : vector<1x128xf32>
    %176 = arith.addf %174, %175 : vector<1x128xf32>
    %177 = arith.maximumf %167, %170 : vector<1x128xf32>
    %178 = arith.maximumf %177, %173 : vector<1x128xf32>
    %179 = arith.maximumf %178, %176 : vector<1x128xf32>
    %180 = arith.subf %167, %179 : vector<1x128xf32>
    %181 = math.exp %180 : vector<1x128xf32>
    %182 = arith.subf %170, %179 : vector<1x128xf32>
    %183 = math.exp %182 : vector<1x128xf32>
    %184 = arith.subf %173, %179 : vector<1x128xf32>
    %185 = math.exp %184 : vector<1x128xf32>
    %186 = arith.subf %176, %179 : vector<1x128xf32>
    %187 = math.exp %186 : vector<1x128xf32>
    %188 = arith.addf %181, %183 : vector<1x128xf32>
    %189 = arith.addf %188, %185 : vector<1x128xf32>
    %190 = arith.addf %189, %187 : vector<1x128xf32>
    %191 = tpu.reciprocal %190 : vector<1x128xf32> -> vector<1x128xf32>
    %192 = arith.mulf %181, %191 : vector<1x128xf32>
    %193 = arith.mulf %183, %191 : vector<1x128xf32>
    %194 = arith.mulf %185, %191 : vector<1x128xf32>
    %195 = arith.mulf %187, %191 : vector<1x128xf32>
    %196 = arith.mulf %192, %6 : vector<1x128xf32>
    %197 = arith.mulf %192, %7 : vector<1x128xf32>
    %198 = arith.mulf %193, %8 : vector<1x128xf32>
    %199 = arith.addf %196, %198 : vector<1x128xf32>
    %200 = arith.mulf %193, %9 : vector<1x128xf32>
    %201 = arith.addf %197, %200 : vector<1x128xf32>
    %202 = arith.mulf %194, %10 : vector<1x128xf32>
    %203 = arith.addf %199, %202 : vector<1x128xf32>
    %204 = arith.mulf %194, %11 : vector<1x128xf32>
    %205 = arith.addf %201, %204 : vector<1x128xf32>
    %206 = arith.mulf %195, %12 : vector<1x128xf32>
    %207 = arith.addf %203, %206 : vector<1x128xf32>
    %208 = arith.mulf %195, %13 : vector<1x128xf32>
    %209 = arith.addf %205, %208 : vector<1x128xf32>
    %210 = tpu.concatenate %72, %74, %117, %119, %162, %164, %207, %209 in 0 : vector<1x128xf32>, vector<1x128xf32>, vector<1x128xf32>, vector<1x128xf32>, vector<1x128xf32>, vector<1x128xf32>, vector<1x128xf32>, vector<1x128xf32> -> vector<8x128xf32>
    %c0_13 = arith.constant 0 : index
    %c0_14 = arith.constant 0 : index
    %211 = vector.load %arg4[%c0_13, %c0_14] : memref<8x8xf32, #tpu.memory_space<vmem>>, vector<8x8xf32>
    %cst_15 = arith.constant dense<0.000000e+00> : vector<8x128xf32>
    %212 = tpu.matmul %211, %210, %cst_15 {dimension_numbers = #tpu.dot_dimension_numbers<[1], [0], [0], [1], [0, 0, 1, 1], [], []>, precision = #tpu.contract_precision<fp32>} : vector<8x8xf32>, vector<8x128xf32>, vector<8x128xf32> -> vector<8x128xf32>
    %c0_16 = arith.constant 0 : index
    %c0_17 = arith.constant 0 : index
    %213 = vector.load %arg5[%c0_16, %c0_17] : memref<8x1xf32, #tpu.memory_space<vmem>>, vector<8x1xf32>
    %214 = vector.broadcast %213 : vector<8x1xf32> to vector<8x128xf32>
    %215 = arith.addf %212, %214 : vector<8x128xf32>
    %c0_18 = arith.constant 0 : index
    %c0_19 = arith.constant 0 : index
    %216 = vector.load %arg6[%c0_18, %c0_19] : memref<8x128xf32, #tpu.memory_space<vmem>>, vector<8x128xf32>
    tpu.vector_store %arg6[%c0_18, %c0_19], %215 {strides = array<i32>} : memref<8x128xf32, #tpu.memory_space<vmem>>, vector<8x128xf32>,
    return
  }
  func.func @transform_0(%arg0: i32) -> (i32, i32) {
    %c0_i32 = arith.constant 0 : i32
    %c0_i32_0 = arith.constant 0 : i32
    return %c0_i32, %arg0 : i32, i32
  }
  func.func @transform_1(%arg0: i32) -> (i32, i32) {
    %c0_i32 = arith.constant 0 : i32
    %c0_i32_0 = arith.constant 0 : i32
    %c0_i32_1 = arith.constant 0 : i32
    return %c0_i32, %c0_i32_0 : i32, i32
  }
  func.func @transform_2(%arg0: i32) -> (i32, i32) {
    %c0_i32 = arith.constant 0 : i32
    %c0_i32_0 = arith.constant 0 : i32
    %c0_i32_1 = arith.constant 0 : i32
    return %c0_i32, %c0_i32_0 : i32, i32
  }
  func.func @transform_3(%arg0: i32) -> (i32, i32) {
    %c0_i32 = arith.constant 0 : i32
    %c0_i32_0 = arith.constant 0 : i32
    %c0_i32_1 = arith.constant 0 : i32
    return %c0_i32, %c0_i32_0 : i32, i32
  }
  func.func @transform_4(%arg0: i32) -> (i32, i32) {
    %c0_i32 = arith.constant 0 : i32
    %c0_i32_0 = arith.constant 0 : i32
    %c0_i32_1 = arith.constant 0 : i32
    return %c0_i32, %c0_i32_0 : i32, i32
  }
  func.func @transform_5(%arg0: i32) -> (i32, i32) {
    %c0_i32 = arith.constant 0 : i32
    %c0_i32_0 = arith.constant 0 : i32
    return %c0_i32, %arg0 : i32, i32
  }
}

</mosaic_0001>

<bundles_post_ra>
// kernel: tpu_custom_call.1
= control target key start
LH: loop header
LB: loop body
LE: loop exit
PB: predicated region body
PF: predicated region fallthrough
CT: control target
= control target key end

     0   :  { %10 = vsyncpa [#allocation3], 0  ;;  %s2123_s0 = inlined_call_operand.vmem [shape: f32[8,256], index: 0, kind: input, shape index: {}]   ;;  %s2124_s1 = inlined_call_operand.hbm [shape: f32[8,8], index: 1, kind: input, shape index: {}]   ;;  %s2125_s2 = inlined_call_operand.vmem [shape: f32[8,1], index: 2, kind: input, shape index: {}]   ;;  %s2126_s3 = inlined_call_operand.hbm [shape: f32[8,8], index: 3, kind: input, shape index: {}]   ;;  %s2127_s4 = inlined_call_operand.vmem [shape: f32[8,1], index: 4, kind: input, shape index: {}]   ;;  %s2128_s5 = inlined_call_operand.hbm [shape: f32[8,256], index: 5, kind: output, shape index: {}]  }
   0x1   :  { %11 = vsyncpa [#allocation6], 0 }
   0x2   :  { %12 = vsyncpa [#allocation4], 0 }
   0x3   :  { %14 = vsyncpa [#allocation4 + $0x1], 0  ;;  %s1833_s18 = smov 0   ;;  %s1835_s19 = smov 0  }
   0x4   :  { %s1837_s20 = smov 0   ;;  %s1839_s21 = smov 0  }
   0x5 LB: > { %s1854_s22 = sadd.s32 4294967295, %s1795_s21   ;;  %s1473_s23 = sadd.s32 4294967294, %s1795_s21   ;;  %s1795_s21 = sphi %s1839_s21, %s2146_s21   ;;  %s1791_s20 = sphi %s1837_s20, %s2145_s20   ;;  %s1787_s19 = sphi %s1835_s19, %s2144_s19   ;;  %s1783_s18 = sphi %s1833_s18, %s2143_s18  }
   0x6   : > { %s1858_s24 = sadd.s32 1, %s1795_s21   ;;  %s137_s25 = sadd.s32 1, %s1791_s20 }
   0x7   : > { %s134_s26 = ssub.s32 %s1795_s21, %s1858_s24  ;;  %p147_p0 = scmp.ne.s32.totalorder %s1791_s20, %s1787_s19 }
   0x8   : > { %p135_p1 = scmp.eq.s32.totalorder %s134_s26, 0  ;;  %p148_p2 = scmp.eq.s32.totalorder %s1854_s22, 1 }
   0x9   : > { %p153_p3 = scmp.ne.s32.totalorder %s1787_s19, %s1783_s18  ;;  %p154_p4 = scmp.eq.s32.totalorder %s1473_s23, 1 }
   0xa   : > { %s1869_s27 = scalar_select %p135_p1, %s1791_s20, %s137_s25  }
   0xb   : > { %p1871_p5 = por %p148_p2, %p147_p0  ;;  %p1875_p6 = por %p154_p4, %p153_p3 }
   0xc   : > { %p1474_p7 = scmp.ge.s32.totalorder %s1795_s21, 1  ;;  %p161_p8 = scmp.lt.s32.totalorder %s1795_s21, 3 }
   0xd   : > { %s2132_s28 = scalar_select %p1871_p5, 1, 0 }
   0xe   : > { %s2133_s29 = scalar_select %p1875_p6, 1, 0 }
   0xf   : > { %p2129_p9 = scmp.eq.s32.totalorder %s1854_s22, 0  ;;  %p1882_p10 = pnand %p1474_p7, %p161_p8 }
  0x10   : > { %s1797_s6 = smov [#allocation2]   ;;  %s1798_s8 = smov [#allocation5]  }
  0x11   : > { %s2134_s30 = scalar_select %p1882_p10, 1, 0 }
  0x12   : > { %s174_s7 = sshll.u32 %s1797_s6, 4  ;;  %p1581_p11 = pneg %p1882_p10  ;;  %s175_s7 = int_to_ptr.vmem [resolvable:$true] %s174_s7 }
  0x13   : > { %s188_s9 = sshll.u32 %s1798_s8, 4  ;;  %s1686_s11 = scalar_lea.vmem %s175_s7, 128  ;;  %s189_s9 = int_to_ptr.vmem [resolvable:$true] %s188_s9 }
  0x14   : > { %p1890_p12 = pnand %p2129_p9, %p1581_p11  ;;  %p1687_p0 = scmp.ne.s32.totalorder %s175_s7, %s1686_s11 }
  0x15   : > { %p1694_p3 = scmp.lt.s32.totalorder %s175_s7, %s175_s7  ;;  %p1695_p4 = scmp.lt.s32.totalorder %s1686_s11, %s1686_s11 }
  0x16   : > { %p1677_p13 = pneg %p1890_p12 }
  0x17   : > { %p1696_p7 = por %p1695_p4, %p1694_p3 }
  0x18   : > { %p1689_p1 = pnand %p1687_p0, %p1677_p13 }
  0x1a   : > { %p1690_p2 = pneg %p1689_p1 }
  0x1c   : > { %p1697_p8 = pnand %p1696_p7, %p1690_p2 }
  0x1e   : > { %1700 = shalt.err (!%p1697_p8)
}
  0x1f   : > { %1584 = dma.hbm_to_vmem [thread:$0]  (!%p1890_p12), %s2124_s1, 128, %s175_s7, [#allocation3]  }
  0x20   : > { %s1712_s14 = scalar_lea.vmem %s189_s9, 128  ;;  %p1720_p0 = scmp.lt.s32.totalorder %s189_s9, %s189_s9 }
  0x21   : > { %p1713_p11 = scmp.ne.s32.totalorder %s189_s9, %s1712_s14  ;;  %p1721_p1 = scmp.lt.s32.totalorder %s1712_s14, %s1712_s14 }
  0x23   : > { %p1715_p9 = pnand %p1713_p11, %p1677_p13  ;;  %p1722_p5 = por %p1721_p1, %p1720_p0 }
  0x25   : > { %p1716_p6 = pneg %p1715_p9 }
  0x27   : > { %p1723_p10 = pnand %p1722_p5, %p1716_p6 }
  0x29   : > { %1726 = shalt.err (!%p1723_p10)
}
  0x2a   : > { %1587 = dma.hbm_to_vmem [thread:$0]  (!%p1890_p12), %s2126_s3, 128, %s189_s9, [#allocation6]  }
  0x2b   : > { %p2136_p2 = scmp.ne.s32.totalorder %s2134_s30, 0 }
  0x2c   : > { %p2137_p3 = scmp.eq.s32.totalorder (!%p2136_p2), %s1854_s22, 0 }
  0x2d   : > { %211 = sbr.rel (%p2136_p2) target bundleno = 584 (0x248), region = 40 }
  0x32   : > { %1770 = dma.done.wait (%p2137_p3), [#allocation3], 128   ;;  %p2138_p13 = pmov %p2137_p3 }
  0x33   : > { %p2139_p9 = pmov %p2137_p3 }
  0x34   : > { %1772 = vsyncadd (%p2138_p13), [#allocation3], 4294967168 }
  0x35   : > { %1774 = dma.done.wait (%p2139_p9), [#allocation6], 128   ;;  %p2140_p5 = pmov %p2137_p3 }
  0x36   : > { %p242_p6 = scmp.lt.s32.totalorder %s1854_s22, 1  ;;  %v1799_v0 = vmov 0.0   ;;  %vm1800_vm0 = vmmov 0   ;;  %v1801_v1 = vmov 0   ;;  %vm254_vm1 = vcmask 64512   ;;  %v247_v3 = vld [vmem:[#allocation2] sm:$0xff] }
  0x37   : > { %1776 = vsyncadd (%p2140_p5), [#allocation6], 4294967168  ;;  %1511 = vmatprep.subr.mxu0 %v1799_v0  ;;  %1516 = vmatprep.subr.mxu1 %v1799_v0  ;;  %v256_v5 = vsel %vm254_vm1, %v247_v3, 0  ;;  %v248_v6 = vld [vmem:[%s2125_s2] sm:$0xff]  ;;  %vm907_vm2 = vcmask 1040384   ;;  %vm909_vm3 = vcmask 1041408  }
  0x38   : > { %s243_s17 = scalar_select %p242_p6, %s1854_s22, 1  ;;  %1513 = vmatprep.mubr.msk.f32.mxu0 %vm1800_vm0, %v1799_v0  ;;  %1518 = vmatprep.mubr.msk.f32.mxu1 %vm1800_vm0, %v1799_v0  ;;  %v324_v7 = vand.u32 4294901760, %v256_v5  ;;  %v922_v9 = vld [vmem:[%s2127_s4] sm:$0xff]  ;;  %vm911_vm4 = vcmask 1042432   ;;  %vm913_vm5 = vcmask 1043456   ;;  %vm915_vm6 = vcmask 1044480  }
  0x39   : > { %1634 = vset.pattern.permute.xlu0 %v1801_v1  ;;  %vm917_vm7 = vcmask 1045504   ;;  %vm919_vm8 = vcmask 1046528   ;;  %s239_s10 = sand.u32 1, %s1787_s19   ;;  %s1484_s12 = sshll.u32 %s1854_s22, 7 }
  0x3a   : > { %s1482_s23 = sshll.u32 %s243_s17, 3  ;;  %251 = vperm.xlu0 %1634, %v248_v6   ;;  %v325_v10 = vsub.f32 %v256_v5, %v324_v7  ;;  %s1481_s11 = sshll.u32 %s239_s10, 3 }
  0x3b   : > { %s245_s30 = scalar_lea.vmem %s2123_s0, %s1482_s23  ;;  %s241_s13 = scalar_lea.vmem [#allocation7], %s1481_s11 }
  0x3c   : > { %v246_v2 = vld [vmem:[%s245_s30] sm:$0xff]  ;;  %v326_v12 = vand.u32 4294901760, %v325_v10  ;;  %s1392_s14 = sshll.u32 %s241_s13, 4  ;;  %s2088_s17 = scalar_lea.hbm %s2128_s5, %s1484_s12  ;;  %s1393_s14 = int_to_ptr.vmem [resolvable:$true] %s1392_s14 }
  0x3d   : > { %v289_v4 = vand.u32 4294901760, %v246_v2  ;;  %s1379_s23 = scalar_lea.sflag [#allocation4], %s239_s10  ;;  %s1727_s25 = scalar_lea.vmem %s1393_s14, 128 }
  0x3e   : > { %925 = vperm.xlu0 %1634, %v922_v9   ;;  %v327_v14 = vsub.f32 %v325_v10, %v326_v12  ;;  %p1728_p10 = scmp.ne.s32.totalorder %s1393_s14, %s1727_s25  ;;  %p2141_p12 = scmp.ne.s32.totalorder %s2132_s28, 0 }
  0x3f   : > { %1512 = vmatpush3.msra.mxu0 %v289_v4  ;;  %v366_v8 = vsub.f32 %v246_v2, %v289_v4  ;;  %s1802_s22 = smov [#allocation7]  }
  0x40   : > { %1521 = vmatprep.subr.mxu0 %v1799_v0  ;;  %v328_v16 = vand.u32 4294901760, %v327_v14  ;;  %p1729_p4 = pnand %p1728_p10, %p2141_p12  ;;  %s1731_s26 = sshll.u32 %s1802_s22, 4  ;;  %s1732_s26 = int_to_ptr.vmem [resolvable:$false] %s1731_s26 }
  0x41   : > { %v367_v11 = vand.u32 4294901760, %v366_v8  ;;  %s1733_s30 = scalar_lea.vmem %s1732_s26, 256  ;;  %p1734_p8 = scmp.lt.s32.totalorder %s1393_s14, %s1732_s26 }
  0x42   : > { %1514 = vmatmul.mubr.f32.vlgmr.msra.gmra.mxu0 %v328_v16  ;;  %p1730_p7 = pneg %p1729_p4  ;;  %p1735_p11 = scmp.lt.s32.totalorder %s1733_s30, %s1727_s25 }
  0x43   : > { %v368_v13 = vsub.f32 %v366_v8, %v367_v11  ;;  %1522 = vmatpush3.msra.mxu0 %v366_v8  ;;  %1523 = vmatprep.mubr.msk.f32.mxu0 %vm1800_vm0, %v1799_v0 }
  0x44   : > { %1531 = vmatprep.subr.mxu0 %v1799_v0  ;;  %p1736_p0 = por %p1735_p11, %p1734_p8 }
  0x45   : > { %v369_v15 = vand.u32 4294901760, %v368_v13 }
  0x46   : > { %1524 = vmatmul.mubr.f32.vlgmr.msra.gmra.mxu0 %v325_v10  ;;  %p1737_p1 = pnand %p1736_p0, %p1730_p7 }
  0x47   : > { %1517 = vmatpush3.msra.mxu1 %v369_v15  ;;  %1532 = vmatpush3.msra.mxu0 %v367_v11 }
  0x48   : > { %1519 = vmatmul.mubr.f32.vlgmr.msra.gmra.mxu1 %v324_v7  ;;  %1526 = vmatprep.subr.mxu1 %v1799_v0 }
  0x49   : > { %1527 = vmatpush3.msra.mxu1 %v289_v4  ;;  %1528 = vmatprep.mubr.msk.f32.mxu1 %vm1800_vm0, %v1799_v0 }
  0x4a   : > { %1536 = vmatprep.subr.mxu1 %v1799_v0  ;;  %1533 = vmatprep.mubr.msk.f32.mxu0 %vm1800_vm0, %v1799_v0 }
  0x4b   : > { %1541 = vmatprep.subr.mxu0 %v1799_v0  ;;  %1534 = vmatmul.mubr.f32.vlgmr.msra.gmra.mxu0 %v324_v7 }
  0x4c   : > { %1529 = vmatmul.mubr.f32.vlgmr.msra.gmra.mxu1 %v326_v12  ;;  %1543 = vmatprep.mubr.msk.f32.mxu0 %vm1800_vm0, %v1799_v0 }
  0x4d   : > { %1537 = vmatpush3.msra.mxu1 %v289_v4  ;;  %1538 = vmatprep.mubr.msk.f32.mxu1 %vm1800_vm0, %v1799_v0 }
  0x4e   : > { %1546 = vmatprep.subr.mxu1 %v1799_v0 }
  0x50   : > { %1539 = vmatmul.mubr.f32.vlgmr.msra.gmra.mxu1 %v324_v7 }
  0x51   : > { %1548 = vmatprep.mubr.msk.f32.mxu1 %vm1800_vm0, %v1799_v0 }
  0xb5   : > { %v252_v17 = vpop.permute.xlu0 %251 }
 0x102   : > { %v330_v18 = vpop.f32.mrf.mxu0 }
 0x103   : > { %v331_v20 = vadd.f32 %v330_v18, %v252_v17 }
 0x104   : > { %v1515_v21 = vpop.f32.mrf.mxu0 }
 0x106   : > { %v480_v24 = vpop.f32.mrf.mxu0 }
 0x108   : > { %v406_v19 = vpop.f32.mrf.mxu1  ;;  %v1525_v27 = vpop.f32.mrf.mxu0 }
 0x109   : > { %v407_v23 = vadd.f32 %v406_v19, %v331_v20 }
 0x10a   : > { %v1520_v22 = vpop.f32.mrf.mxu1 }
 0x10b   : > { %v481_v26 = vadd.f32 %v480_v24, %v407_v23  ;;  %v628_v30 = vpop.f32.mrf.mxu0 }
 0x10c   : > { %v554_v25 = vpop.f32.mrf.mxu1 }
 0x10d   : > { %v555_v29 = vadd.f32 %v554_v25, %v481_v26  ;;  %v1535_v33 = vpop.f32.mrf.mxu0 }
 0x10e   : > { %v1530_v28 = vpop.f32.mrf.mxu1 }
 0x10f   : > { %v629_v32 = vadd.f32 %v628_v30, %v555_v29 }
 0x110   : > { %v700_v31 = vpop.f32.mrf.mxu1 }
 0x111   : > { %v1958_v35 = vadd.f32 %v700_v31, %v629_v32 }
 0x112   : > { %v1540_v34 = vpop.f32.mrf.mxu1 }
 0x113   : > { %v704_v36 = vmul.f32 0.70710677, %v1958_v35 }
 0x115   : > { %v705_v37 = vmul.f32 %v704_v36, %v1958_v35  ;;  %v711_v38 = vrot.slane %v704_v36, 2  ;;  %v718_v39 = vrot.slane %v704_v36, 4  ;;  %v725_v40 = vrot.slane %v704_v36, 6 }
 0x117   : > { %v707_v41 = vrot.slane %v705_v37, 1  ;;  %v713_v42 = vmul.f32 %v711_v38, %v1958_v35  ;;  %v720_v43 = vmul.f32 %v718_v39, %v1958_v35  ;;  %v727_v44 = vmul.f32 %v725_v40, %v1958_v35 }
 0x119   : > { %v715_v45 = vrot.slane %v713_v42, 1  ;;  %v722_v46 = vrot.slane %v720_v43, 1  ;;  %v729_v47 = vrot.slane %v727_v44, 1  ;;  %v709_v48 = vadd.f32 %v707_v41, %v705_v37 }
 0x11b   : > { %v717_v49 = vadd.f32 %v715_v45, %v713_v42  ;;  %v724_v50 = vadd.f32 %v722_v46, %v720_v43  ;;  %v731_v51 = vadd.f32 %v729_v47, %v727_v44 }
 0x11d   : > { %v732_v52 = vmax.f32 %v709_v48, %v717_v49  ;;  %v784_v53 = vmax.f32 %v731_v51, %v709_v48  ;;  %v821_v54 = vmax.f32 %v724_v50, %v731_v51  ;;  %v858_v55 = vmax.f32 %v717_v49, %v724_v50 }
 0x11f   : > { %v733_v56 = vmax.f32 %v732_v52, %v724_v50  ;;  %v785_v57 = vmax.f32 %v784_v53, %v717_v49  ;;  %v822_v58 = vmax.f32 %v821_v54, %v709_v48  ;;  %v859_v62 = vmax.f32 %v858_v55, %v731_v51 }
 0x121   : > { %v734_v59 = vmax.f32 %v733_v56, %v731_v51  ;;  %v786_v60 = vmax.f32 %v785_v57, %v724_v50  ;;  %v823_v61 = vmax.f32 %v822_v58, %v717_v49  ;;  %v860_v14 = vmax.f32 %v859_v62, %v709_v48  ;;  %v921_v56 = vld [vmem:[#allocation5] sm:$0xff] }
 0x123   : > { %v735_v63 = vsub.f32 %v709_v48, %v734_v59  ;;  %v738_v1 = vsub.f32 %v717_v49, %v734_v59  ;;  %v741_v2 = vsub.f32 %v724_v50, %v734_v59  ;;  %v744_v3 = vsub.f32 %v731_v51, %v734_v59 }
 0x124   : > { %v787_v4 = vsub.f32 %v731_v51, %v786_v60  ;;  %v790_v5 = vsub.f32 %v709_v48, %v786_v60  ;;  %v793_v9 = vsub.f32 %v717_v49, %v786_v60  ;;  %v796_v11 = vsub.f32 %v724_v50, %v786_v60 }
 0x125   : > { %v736_v6 = vmul.f32 1.442695, %v735_v63  ;;  %v739_v7 = vmul.f32 1.442695, %v738_v1  ;;  %v742_v8 = vmul.f32 1.442695, %v741_v2  ;;  %v824_v13 = vsub.f32 %v724_v50, %v823_v61 }
 0x126   : > { %v745_v10 = vmul.f32 1.442695, %v744_v3  ;;  %v788_v12 = vmul.f32 1.442695, %v787_v4  ;;  %v791_v15 = vmul.f32 1.442695, %v790_v5  ;;  %v827_v16 = vsub.f32 %v731_v51, %v823_v61 }
 0x127   : > { %1635 = vpow2.f32 %v736_v6  ;;  %v794_v17 = vmul.f32 1.442695, %v793_v9  ;;  %v830_v18 = vsub.f32 %v709_v48, %v823_v61  ;;  %v797_v19 = vmul.f32 1.442695, %v796_v11 }
 0x128   : > { %1637 = vpow2.f32 %v739_v7  ;;  %v833_v20 = vsub.f32 %v717_v49, %v823_v61  ;;  %v825_v21 = vmul.f32 1.442695, %v824_v13  ;;  %v861_v22 = vsub.f32 %v717_v49, %v860_v14 }
 0x129   : > { %1639 = vpow2.f32 %v742_v8  ;;  %v828_v23 = vmul.f32 1.442695, %v827_v16  ;;  %v864_v24 = vsub.f32 %v724_v50, %v860_v14  ;;  %v831_v25 = vmul.f32 1.442695, %v830_v18 }
 0x12a   : > { %1641 = vpow2.f32 %v745_v10  ;;  %v834_v26 = vmul.f32 1.442695, %v833_v20  ;;  %v867_v27 = vsub.f32 %v731_v51, %v860_v14  ;;  %v862_v28 = vmul.f32 1.442695, %v861_v22 }
 0x12b   : > { %1643 = vpow2.f32 %v788_v12  ;;  %v865_v29 = vmul.f32 1.442695, %v864_v24  ;;  %v870_v30 = vsub.f32 %v709_v48, %v860_v14  ;;  %v929_v60 = vsel %vm254_vm1, %v921_v56, 0 }
 0x12c   : > { %1645 = vpow2.f32 %v791_v15  ;;  %v868_v31 = vmul.f32 1.442695, %v867_v27  ;;  %v1990_v1 = vand.u32 4294901760, %v929_v60  ;;  %v1993_v3 = vrot.slane %v1958_v35, 1 }
 0x12d   : > { %1647 = vpow2.f32 %v794_v17  ;;  %v871_v33 = vmul.f32 1.442695, %v870_v30  ;;  %v1996_v4 = vrot.slane %v1958_v35, 2  ;;  %v1999_v8 = vrot.slane %v1958_v35, 3 }
 0x12e   : > { %1649 = vpow2.f32 %v797_v19  ;;  %v2002_v10 = vrot.slane %v1958_v35, 5  ;;  %v2005_v11 = vsub.f32 %v929_v60, %v1990_v1  ;;  %v2012_v17 = vrot.slane %v1958_v35, 4 }
 0x12f   : > { %1651 = vpow2.f32 %v825_v21  ;;  %v2016_v19 = vrot.slane %v1958_v35, 6  ;;  %v2019_v20 = vrot.slane %v1958_v35, 7 }
 0x130   : > { %1653 = vpow2.f32 %v828_v23 }
 0x131   : > { %1655 = vpow2.f32 %v831_v25 }
 0x132   : > { %1657 = vpow2.f32 %v834_v26 }
 0x133   : > { %1659 = vpow2.f32 %v862_v28 }
 0x134   : > { %v1636_v32 = vpop.eup %1635  ;;  %1661 = vpow2.f32 %v865_v29 }
 0x135   : > { %v1638_v34 = vpop.eup %1637  ;;  %1663 = vpow2.f32 %v868_v31 }
 0x136   : > { %v1640_v36 = vpop.eup %1639  ;;  %v747_v37 = vadd.f32 %v1638_v34, %v1636_v32  ;;  %1665 = vpow2.f32 %v871_v33 }
 0x137   : > { %v1642_v38 = vpop.eup %1641 }
 0x138   : > { %v1644_v39 = vpop.eup %1643  ;;  %v748_v40 = vadd.f32 %v1640_v36, %v747_v37 }
 0x139   : > { %v1646_v41 = vpop.eup %1645 }
 0x13a   : > { %v1648_v42 = vpop.eup %1647  ;;  %v749_v43 = vadd.f32 %v1642_v38, %v748_v40  ;;  %v799_v44 = vadd.f32 %v1646_v41, %v1644_v39 }
 0x13b   : > { %v1650_v45 = vpop.eup %1649 }
 0x13c   : > { %v1965_v46 = vpop.eup %1651  ;;  %1667 = vrcp.f32 %v749_v43  ;;  %v800_v47 = vadd.f32 %v1648_v42, %v799_v44 }
 0x13d   : > { %v1967_v48 = vpop.eup %1653 }
 0x13e   : > { %v1969_v49 = vpop.eup %1655  ;;  %v801_v50 = vadd.f32 %v1650_v45, %v800_v47  ;;  %v836_v51 = vadd.f32 %v1967_v48, %v1965_v46 }
 0x13f   : > { %v1973_v52 = vpop.eup %1657 }
 0x140   : > { %v1975_v53 = vpop.eup %1659  ;;  %1669 = vrcp.f32 %v801_v50  ;;  %v837_v54 = vadd.f32 %v1969_v49, %v836_v51 }
 0x141   : > { %v1978_v55 = vpop.eup %1661 }
 0x142   : > { %v838_v57 = vadd.f32 %v1973_v52, %v837_v54  ;;  %v873_v58 = vadd.f32 %v1978_v55, %v1975_v53  ;;  %v1983_v59 = vpop.eup %1663 }
 0x143   : > { %v1987_v62 = vpop.eup %1665 }
 0x144   : > { %1671 = vrcp.f32 %v838_v57  ;;  %v874_v61 = vadd.f32 %v1983_v59, %v873_v58 }
 0x146   : > { %v875_v63 = vadd.f32 %v1987_v62, %v874_v61 }
 0x148   : > { %1673 = vrcp.f32 %v875_v63 }
 0x149   : > { %v1668_v2 = vpop.eup %1667 }
 0x14a   : > { %v751_v5 = vmul.f32 %v1668_v2, %v1636_v32  ;;  %v752_v6 = vmul.f32 %v1668_v2, %v1638_v34  ;;  %v753_v7 = vmul.f32 %v1668_v2, %v1640_v36  ;;  %v754_v9 = vmul.f32 %v1668_v2, %v1642_v38 }
 0x14b   : > { %v999_v36 = vand.u32 4294901760, %v2005_v11 }
 0x14c   : > { %v755_v12 = vmul.f32 %v751_v5, %v1958_v35  ;;  %v759_v13 = vmul.f32 %v1993_v3, %v751_v5  ;;  %v762_v14 = vmul.f32 %v1996_v4, %v752_v6  ;;  %v766_v15 = vmul.f32 %v1999_v8, %v752_v6 }
 0x14d   : > { %v1670_v16 = vpop.eup %1669  ;;  %v774_v18 = vmul.f32 %v2002_v10, %v753_v7  ;;  %v770_v25 = vmul.f32 %v2012_v17, %v753_v7  ;;  %v782_v26 = vmul.f32 %v2019_v20, %v754_v9  ;;  %v778_v38 = vmul.f32 %v2016_v19, %v754_v9 }
 0x14e   : > { %v763_v21 = vadd.f32 %v762_v14, %v755_v12  ;;  %v767_v22 = vadd.f32 %v766_v15, %v759_v13  ;;  %v803_v23 = vmul.f32 %v1670_v16, %v1644_v39  ;;  %v804_v24 = vmul.f32 %v1670_v16, %v1646_v41 }
 0x14f   : > { %v805_v27 = vmul.f32 %v1670_v16, %v1648_v42  ;;  %v806_v29 = vmul.f32 %v1670_v16, %v1650_v45 }
 0x150   : > { %v775_v28 = vadd.f32 %v774_v18, %v767_v22  ;;  %v807_v30 = vmul.f32 %v803_v23, %v2016_v19  ;;  %v808_v31 = vmul.f32 %v803_v23, %v2019_v20  ;;  %v809_v33 = vmul.f32 %v804_v24, %v1958_v35 }
 0x151   : > { %v1672_v32 = vpop.eup %1671  ;;  %v811_v34 = vmul.f32 %v804_v24, %v1993_v3  ;;  %v771_v37 = vadd.f32 %v770_v25, %v763_v21  ;;  %v815_v40 = vmul.f32 %v805_v27, %v1999_v8  ;;  %v813_v45 = vmul.f32 %v805_v27, %v1996_v4 }
 0x152   : > { %v783_v39 = vadd.f32 %v782_v26, %v775_v28  ;;  %v810_v41 = vadd.f32 %v809_v33, %v807_v30  ;;  %v840_v43 = vmul.f32 %v1672_v32, %v1965_v46  ;;  %v841_v44 = vmul.f32 %v1672_v32, %v1967_v48 }
 0x153   : > { %v812_v42 = vadd.f32 %v811_v34, %v808_v31  ;;  %v819_v47 = vmul.f32 %v806_v29, %v2002_v10  ;;  %v842_v50 = vmul.f32 %v1672_v32, %v1969_v49  ;;  %v843_v51 = vmul.f32 %v1672_v32, %v1973_v52 }
 0x154   : > { %v844_v57 = vmul.f32 %v840_v43, %v2012_v17  ;;  %v845_v58 = vmul.f32 %v840_v43, %v2002_v10  ;;  %v896_v60 = vrot.slane %v783_v39, 7  ;;  %v779_v46 = vadd.f32 %v778_v38, %v771_v37 }
 0x155   : > { %v1674_v54 = vpop.eup %1673  ;;  %v816_v56 = vadd.f32 %v815_v40, %v812_v42  ;;  %v817_v48 = vmul.f32 %v806_v29, %v2012_v17  ;;  %v846_v61 = vmul.f32 %v841_v44, %v2016_v19  ;;  %v848_v63 = vmul.f32 %v841_v44, %v2019_v20 }
 0x156   : > { %v814_v2 = vadd.f32 %v813_v45, %v810_v41  ;;  %v850_v52 = vmul.f32 %v842_v50, %v1958_v35  ;;  %v852_v5 = vmul.f32 %v842_v50, %v1993_v3  ;;  %v877_v9 = vmul.f32 %v1674_v54, %v1975_v53 }
 0x157   : > { %v820_v49 = vadd.f32 %v819_v47, %v816_v56  ;;  %v847_v6 = vadd.f32 %v846_v61, %v844_v57  ;;  %v849_v7 = vadd.f32 %v848_v63, %v845_v58  ;;  %v878_v12 = vmul.f32 %v1674_v54, %v1978_v55 }
 0x158   : > { %v856_v13 = vmul.f32 %v843_v51, %v1999_v8  ;;  %v879_v14 = vmul.f32 %v1674_v54, %v1983_v59  ;;  %v880_v15 = vmul.f32 %v1674_v54, %v1987_v62  ;;  %v908_v16 = vsel %vm907_vm2, %v779_v46, %v896_v60  ;;  %v926_v54 = vpop.permute.xlu0 %925 }
 0x159   : > { %v851_v18 = vadd.f32 %v850_v52, %v847_v6  ;;  %v853_v21 = vadd.f32 %v852_v5, %v849_v7  ;;  %v881_v22 = vmul.f32 %v877_v9, %v1996_v4  ;;  %v882_v23 = vmul.f32 %v877_v9, %v1999_v8 }
 0x15a   : > { %v818_v24 = vadd.f32 %v817_v48, %v814_v2  ;;  %v854_v25 = vmul.f32 %v843_v51, %v1996_v4  ;;  %v883_v53 = vmul.f32 %v878_v12, %v2012_v17  ;;  %v885_v55 = vmul.f32 %v878_v12, %v2002_v10 }
 0x15b   : > { %v857_v26 = vadd.f32 %v856_v13, %v853_v21  ;;  %v887_v59 = vmul.f32 %v879_v14, %v2016_v19  ;;  %v889_v62 = vmul.f32 %v879_v14, %v2019_v20  ;;  %v899_v27 = vrot.slane %v820_v49, 7 }
 0x15c   : > { %v855_v28 = vadd.f32 %v854_v25, %v851_v18  ;;  %v884_v29 = vadd.f32 %v883_v53, %v881_v22  ;;  %v886_v30 = vadd.f32 %v885_v55, %v882_v23  ;;  %v910_v31 = vsel %vm909_vm3, %v908_v16, %v818_v24 }
 0x15d   : > { %v891_v8 = vmul.f32 %v880_v15, %v1958_v35  ;;  %v902_v32 = vrot.slane %v857_v26, 7  ;;  %v912_v4 = vsel %vm911_vm4, %v910_v31, %v899_v27  ;;  %v893_v10 = vmul.f32 %v880_v15, %v1993_v3 }
 0x15e   : > { %v888_v33 = vadd.f32 %v887_v59, %v884_v29  ;;  %v890_v17 = vadd.f32 %v889_v62, %v886_v30  ;;  %v914_v34 = vsel %vm913_vm5, %v912_v4, %v855_v28  ;;  %v1000_v38 = vsub.f32 %v2005_v11, %v999_v36 }
 0x15f   : > { %v916_v19 = vsel %vm915_vm6, %v914_v34, %v902_v32 }
 0x160   : > { %v892_v20 = vadd.f32 %v891_v8, %v888_v33  ;;  %v894_v37 = vadd.f32 %v893_v10, %v890_v17  ;;  %v1001_v41 = vand.u32 4294901760, %v1000_v38 }
 0x162   : > { %v905_v35 = vrot.slane %v894_v37, 7  ;;  %v918_v39 = vsel %vm917_vm7, %v916_v19, %v892_v20 }
 0x164   : > { %v920_v40 = vsel %vm919_vm8, %v918_v39, %v905_v35 }
 0x165   : > { %v962_v42 = vand.u32 4294901760, %v920_v40 }
 0x167   : > { %1542 = vmatpush3.msra.mxu0 %v962_v42  ;;  %v1039_v43 = vsub.f32 %v920_v40, %v962_v42 }
 0x168   : > { %1544 = vmatmul.mubr.f32.vlgmr.msra.gmra.mxu0 %v1001_v41  ;;  %1551 = vmatprep.subr.mxu0 %v1799_v0 }
 0x169   : > { %1552 = vmatpush3.msra.mxu0 %v1039_v43  ;;  %1553 = vmatprep.mubr.msk.f32.mxu0 %vm1800_vm0, %v1799_v0  ;;  %v1040_v3 = vand.u32 4294901760, %v1039_v43 }
 0x16a   : > { %1561 = vmatprep.subr.mxu0 %v1799_v0 }
 0x16b   : > { %v1041_v44 = vsub.f32 %v1039_v43, %v1040_v3 }
 0x16c   : > { %1554 = vmatmul.mubr.f32.vlgmr.msra.gmra.mxu0 %v2005_v11 }
 0x16d   : > { %1562 = vmatpush3.msra.mxu0 %v1040_v3  ;;  %v1042_v45 = vand.u32 4294901760, %v1041_v44  ;;  %1563 = vmatprep.mubr.msk.f32.mxu0 %vm1800_vm0, %v1799_v0 }
 0x16f   : > { %1547 = vmatpush3.msra.mxu1 %v1042_v45 }
 0x170   : > { %1549 = vmatmul.mubr.f32.vlgmr.msra.gmra.mxu1 %v1990_v1  ;;  %1556 = vmatprep.subr.mxu1 %v1799_v0 }
 0x171   : > { %1557 = vmatpush3.msra.mxu1 %v962_v42  ;;  %1558 = vmatprep.mubr.msk.f32.mxu1 %vm1800_vm0, %v1799_v0 }
 0x172   : > { %1566 = vmatprep.subr.mxu1 %v1799_v0  ;;  %1564 = vmatmul.mubr.f32.vlgmr.msra.gmra.mxu0 %v1990_v1 }
 0x174   : > { %1559 = vmatmul.mubr.f32.vlgmr.msra.gmra.mxu1 %v999_v36 }
 0x175   : > { %1567 = vmatpush3.msra.mxu1 %v962_v42  ;;  %1568 = vmatprep.mubr.msk.f32.mxu1 %vm1800_vm0, %v1799_v0 }
 0x178   : > { %1569 = vmatmul.mubr.f32.vlgmr.msra.gmra.mxu1 %v1990_v1 }
 0x228   : > { %v1003_v47 = vpop.f32.mrf.mxu0 }
 0x229   : > { %v1004_v57 = vadd.f32 %v1003_v47, %v926_v54 }
 0x22a   : > { %v1545_v50 = vpop.f32.mrf.mxu0 }
 0x22c   : > { %v1153_v51 = vpop.f32.mrf.mxu0 }
 0x22e   : > { %v1555_v56 = vpop.f32.mrf.mxu0 }
 0x230   : > { %v1079_v58 = vpop.f32.mrf.mxu1 }
 0x231   : > { %v1080_v60 = vadd.f32 %v1079_v58, %v1004_v57 }
 0x232   : > { %v1550_v46 = vpop.f32.mrf.mxu1  ;;  %v1301_v11 = vpop.f32.mrf.mxu0 }
 0x233   : > { %v1154_v36 = vadd.f32 %v1153_v51, %v1080_v60 }
 0x234   : > { %v1227_v48 = vpop.f32.mrf.mxu1  ;;  %v1565_v61 = vpop.f32.mrf.mxu0 }
 0x235   : > { %v1228_v0 = vadd.f32 %v1227_v48, %v1154_v36 }
 0x236   : > { %v1560_v63 = vpop.f32.mrf.mxu1 }
 0x237   : > { %v1302_v1 = vadd.f32 %v1301_v11, %v1228_v0 }
 0x238   : > { %v1373_v2 = vpop.f32.mrf.mxu1 }
 0x239   : > { %v1374_v49 = vadd.f32 %v1373_v2, %v1302_v1 }
 0x23a   : > { %v1570_v52 = vpop.f32.mrf.mxu1 }
 0x23b   : > { %1377 = vst [vmem:[%s241_s13] sm:$0xff] %v1374_v49 }
 0x23c   : > { %1740 = shalt.err (!%p1737_p1)
}
 0x23d   : > { %s1741_s6 = scalar_lea.hbm %s2088_s17, 128  ;;  %s1745_s9 = scalar_lea.hbm %s2128_s5, 256 }
 0x23e   : > { %p1742_p2 = scmp.ne.s32.totalorder %s2088_s17, %s1741_s6  ;;  %p1746_p9 = scmp.lt.s32.totalorder %s2088_s17, %s2128_s5 }
 0x23f   : > { %p1747_p5 = scmp.lt.s32.totalorder %s1745_s9, %s1741_s6 }
 0x240   : > { %p1743_p3 = pnand %p1742_p2, %p2141_p12 }
 0x241   : > { %p1748_p6 = por %p1747_p5, %p1746_p9 }
 0x242   : > { %p1744_p13 = pneg %p1743_p3 }
 0x244   : > { %p1749_p10 = pnand %p1748_p6, %p1744_p13 }
 0x246   : > { %1752 = shalt.err (!%p1749_p10)
}
 0x247   : > { %1579 = dma.vmem_to_hbm [thread:$0]  (%p2141_p12), %s1393_s14, 128, %s2088_s17, %s1379_s23  }
 0x248 PF: > { %p1596_p4 = scmp.ge.s32.totalorder %s1795_s21, 2  ;;  %s1404_s12 = sand.u32 1, %s1783_s18  }
 0x249   : > { %p2142_p7 = scmp.ne.s32.totalorder %s2133_s29, 0  ;;  %s1405_s13 = scalar_lea.sflag [#allocation4], %s1404_s12 }
 0x24b   : > { %p1589_p8 = pnand %p1596_p4, %p2142_p7 }
 0x24d   : > { %p1590_p11 = pneg %p1589_p8 }
 0x24f   : > { %1778 = dma.done.wait (%p1590_p11), %s1405_s13, 128  }
 0x250   : > { %1780 = vsyncadd (%p1590_p11), %s1405_s13, 4294967168  ;;  %p17_p0 = scmp.ge.s32.totalorder %s1858_s24, 4   ;;  %s2143_s18 = smov %s1787_s19 }
 0x251   : > { %s2144_s19 = smov %s1791_s20  ;;  %s2145_s20 = smov %s1869_s27 }
 0x252   : > { %s2146_s21 = smov %s1858_s24  ;;  %19 = sbr.rel (!%p17_p0) target bundleno = 5 (0x5), region = 84 }
 0x257   :  { %1410 = vsyncpa [#allocation3], 1 }
 0x258   :  { %1412 = vsyncpa [#allocation3 + $0x1], 1 }
 0x259   :  { %1413 = vsyncpa [#allocation6], 1 }
 0x25a   :  { %1414 = vsyncpa [#allocation4], 1 }
 0x25b   :  { %1416 = vsyncpa [#allocation4 + $0x1], 1 }

</bundles_post_ra>
